<compile_context>
chip_gen: v5e
topology: v5e:2x2
jax: 0.10.0
libtpu: 0.0.40
codegen_flags: <defaults>
</compile_context>

<pallas_src>
import functools

import jax
import jax.numpy as jnp
from jax.experimental import pallas as pl
from jax.experimental.pallas import tpu as pltpu


def _round_up(x, m):
    return ((x + m - 1) // m) * m


def _packed_layout(in_dim, hidden_dim, num_actions):
    """Row offsets of each section inside the single packed (rows, C) buffer."""
    # Lane-dense width: multiple of 128; bump to multiples of 256 once the feature
    # dims are big enough to fill a v6e/v7x 256-wide MXU pass (no zero work below that).
    widest = max(hidden_dim, num_actions, 1)
    lane = 256 if widest >= 256 else 128
    c = _round_up(widest, lane)
    in_p = _round_up(in_dim, 8)              # sublane-aligned state feature width
    t1_off = 0                               # theta1.T  (in_p, c)
    t2_off = in_p                            # theta2.T  (c, c)
    tm_off = in_p + c                        # thetaM.T  (c, c)
    b_off = in_p + 2 * c                     # biases: rows b_off+0/1/2 of one 8-row section
    rows = b_off + 8
    return c, in_p, rows, (t1_off, t2_off, tm_off, b_off)


def prepare_packed_params(params, in_dim, hidden_dim, num_actions, dtype=jnp.float32):
    """One-time (per task/params) precompute of theta_k.T + packing into one buffer.

    Uses the exact APDLinear.get_theta association: theta = (tau_l @ shared) @ tau_r.
    All padding regions are exactly zero (the kernel's correctness invariant).
    Pass dtype=jnp.bfloat16 to halve weight DMA/VMEM and hit the bf16 MXU natively.
    """
    c, in_p, rows, (t1_off, t2_off, tm_off, b_off) = _packed_layout(
        in_dim, hidden_dim, num_actions
    )

    def theta_t(tl, sw, tr):
        return ((tl @ sw) @ tr).T.astype(jnp.float32)  # pre-transposed

    t1t = theta_t(params["tl1"], params["sw1"], params["tr1"])  # (in_dim, hidden)
    t2t = theta_t(params["tl2"], params["sw2"], params["tr2"])  # (hidden, hidden)
    tmt = theta_t(params["tlm"], params["swm"], params["trm"])  # (hidden, num_actions)

    buf = jnp.zeros((rows, c), jnp.float32)
    buf = buf.at[t1_off : t1_off + in_dim, :hidden_dim].set(t1t)
    buf = buf.at[t2_off : t2_off + hidden_dim, :hidden_dim].set(t2t)
    buf = buf.at[tm_off : tm_off + hidden_dim, :num_actions].set(tmt)
    buf = buf.at[b_off + 0, :hidden_dim].set(params["b1"][:, 0])
    buf = buf.at[b_off + 1, :hidden_dim].set(params["b2"][:, 0])
    buf = buf.at[b_off + 2, :num_actions].set(params["bm"][:, 0])
    return buf.astype(dtype)


def _apd_kernel(state_ref, w_ref, out_ref, *, in_p, c, num_actions, offs):
    t1_off, t2_off, tm_off, b_off = offs
    w_dtype = w_ref.dtype

    # Static, 8-row-aligned slices of the single packed parameter buffer.
    t1 = w_ref[pl.ds(t1_off, in_p), :]       # (in_p, C)  theta1.T (lane-padded)
    t2 = w_ref[pl.ds(t2_off, c), :]          # (C, C)     theta2.T (zero-padded)
    tm = w_ref[pl.ds(tm_off, c), :]          # (C, C)     thetaM.T (zero-padded)
    biases = w_ref[pl.ds(b_off, 8), :].astype(jnp.float32)  # rows 0/1/2 = b1/b2/bm
    b1, b2, bm = biases[0:1], biases[1:2], biases[2:3]

    x = state_ref[...].astype(w_dtype)       # (TB, in_p); no-op cast for f32 weights
    h = jnp.dot(x, t1, preferred_element_type=jnp.float32) + b1
    h = jnp.maximum(h, 0.0).astype(w_dtype)
    h = jnp.dot(h, t2, preferred_element_type=jnp.float32) + b2
    h = jnp.maximum(h, 0.0).astype(w_dtype)
    mean = jnp.dot(h, tm, preferred_element_type=jnp.float32) + bm
    # Narrow, full-last-dim store: no 16x padded write amplification, no wrapper slice.
    out_ref[...] = mean[:, :num_actions].astype(out_ref.dtype)


_TB_LARGE = 512  # batch tile once per-step overhead / VMEM residency matter


def apd_policy_forward(state, packed, *, in_dim, hidden_dim, num_actions):
    """Hot-path forward: state (batch, in_dim), packed = prepare_packed_params(...)."""
    batch = state.shape[0]
    c, in_p, rows, offs = _packed_layout(in_dim, hidden_dim, num_actions)
    assert packed.shape == (rows, c), (packed.shape, (rows, c))

    # Batch tiling: single block for small/medium batches; fixed 512-row tiles with a
    # zero-padded tail above that (keeps pipelining + megacore split for any batch).
    if batch <= _TB_LARGE:
        tb, padded_batch = batch, batch
    else:
        tb = _TB_LARGE
        padded_batch = _round_up(batch, tb)

    x = state.astype(jnp.float32)
    if padded_batch != batch or in_p != in_dim:
        x = jnp.zeros((padded_batch, in_p), jnp.float32).at[:batch, :in_dim].set(x)

    grid = (padded_batch // tb,)
    w_itemsize = jnp.dtype(packed.dtype).itemsize

    # Raise scoped VMEM only when the footprint would trip the 16/32 MiB defaults.
    vmem_need = (
        rows * c * w_itemsize                        # resident weights (Buffered(1))
        + 2 * tb * in_p * 4                          # double-buffered state tiles
        + 2 * tb * _round_up(num_actions, 128) * 4   # double-buffered out tiles
        + 4 * tb * c * 4                             # in-kernel f32 temporaries
    )
    vmem_limit = None
    if vmem_need > 12 * 1024 * 1024:
        vmem_limit = int(min(2 * vmem_need, 64 * 1024 * 1024))

    flops = 2 * padded_batch * (in_p * c + 2 * c * c)
    bytes_accessed = (
        rows * c * w_itemsize + 4 * padded_batch * in_p + 4 * padded_batch * num_actions
    )

    out = pl.pallas_call(
        functools.partial(
            _apd_kernel, in_p=in_p, c=c, num_actions=num_actions, offs=offs
        ),
        out_shape=jax.ShapeDtypeStruct((padded_batch, num_actions), jnp.float32),
        grid=grid,
        in_specs=[
            pl.BlockSpec((tb, in_p), lambda i: (i, 0)),
            # Constant index map -> fetched once; Buffered(1) keeps a single resident copy.
            pl.BlockSpec((rows, c), lambda i: (0, 0), pipeline_mode=pl.Buffered(1)),
        ],
        out_specs=pl.BlockSpec((tb, num_actions), lambda i: (i, 0)),
        compiler_params=pltpu.CompilerParams(
            dimension_semantics=("parallel",),
            vmem_limit_bytes=vmem_limit,
        ),
        cost_estimate=pl.CostEstimate(
            flops=flops, transcendentals=0, bytes_accessed=bytes_accessed
        ),
    )(x, packed)

    # TODO(synk): for the production batch~2 latency path, hide the per-call weight DMA
    # via cross-call prefetch (P10) or pin `packed` in VMEM with
    # pltpu.with_memory_space_constraint instead of re-fetching it every call.
    return out if padded_batch == batch else out[:batch]


def reference_forward(state, p):
    """Pure-JAX reference matching the PyTorch module exactly."""

    def theta(tl, sw, tr):
        return (tl @ sw) @ tr

    x = jnp.maximum(state @ theta(p["tl1"], p["sw1"], p["tr1"]).T + p["b1"][:, 0], 0.0)
    x = jnp.maximum(x @ theta(p["tl2"], p["sw2"], p["tr2"]).T + p["b2"][:, 0], 0.0)
    return x @ theta(p["tlm"], p["swm"], p["trm"]).T + p["bm"][:, 0]


def make_params(key, shared_info_dim, in_dim, hidden_dim, num_actions):
    # Deterministic synthetic init (xavier-ish scaled normals). Biases are (out, 1)
    # like the PyTorch module; made nonzero so the bias path is actually exercised.
    ks = jax.random.split(key, 12)

    def xav(k, shape):
        fan_out, fan_in = shape[0], shape[1]
        scale = jnp.sqrt(2.0 / (fan_in + fan_out))
        return (scale * jax.random.normal(k, shape)).astype(jnp.float32)

    s = shared_info_dim
    return {
        # linear1: in_dim -> hidden_dim
        "sw1": xav(ks[0], (s, s)),
        "tl1": xav(ks[1], (hidden_dim, s)),
        "tr1": xav(ks[2], (s, in_dim)),
        "b1": (0.1 * jax.random.normal(ks[3], (hidden_dim, 1))).astype(jnp.float32),
        # linear2: hidden_dim -> hidden_dim
        "sw2": xav(ks[4], (s, s)),
        "tl2": xav(ks[5], (hidden_dim, s)),
        "tr2": xav(ks[6], (s, hidden_dim)),
        "b2": (0.1 * jax.random.normal(ks[7], (hidden_dim, 1))).astype(jnp.float32),
        # mean_linear: hidden_dim -> num_actions
        "swm": xav(ks[8], (s, s)),
        "tlm": xav(ks[9], (num_actions, s)),
        "trm": xav(ks[10], (s, hidden_dim)),
        "bm": (0.1 * jax.random.normal(ks[11], (num_actions, 1))).astype(jnp.float32),
    }


if __name__ == "__main__":
    # Small shapes consistent with the module: one task added via
    # add_task(in_dim, out_dim=num_actions, hidden_dim).
    batch, in_dim, hidden_dim, num_actions, shared_info_dim = 2, 16, 32, 8, 32

    key = jax.random.PRNGKey(0)
    k_state, k_params = jax.random.split(key)
    state = jax.random.normal(k_state, (batch, in_dim), dtype=jnp.float32)
    params = make_params(k_params, shared_info_dim, in_dim, hidden_dim, num_actions)

    ref = reference_forward(state, params)

    # f32 packed weights (exact path).
    packed = jax.block_until_ready(
        prepare_packed_params(params, in_dim, hidden_dim, num_actions)
    )
    mean = jax.block_until_ready(
        apd_policy_forward(
            state, packed, in_dim=in_dim, hidden_dim=hidden_dim, num_actions=num_actions
        )
    )
    assert mean.shape == (batch, num_actions)
    assert jnp.allclose(mean, ref, atol=1e-4, rtol=1e-4), "Pallas f32 result mismatch"

    # bf16 packed weights (v6e/v7x MXU-native low-precision path; f32 accumulation).
    packed_bf16 = jax.block_until_ready(
        prepare_packed_params(
            params, in_dim, hidden_dim, num_actions, dtype=jnp.bfloat16
        )
    )
    mean_bf16 = jax.block_until_ready(
        apd_policy_forward(
            state,
            packed_bf16,
            in_dim=in_dim,
            hidden_dim=hidden_dim,
            num_actions=num_actions,
        )
    )
    assert mean_bf16.shape == (batch, num_actions)
    assert jnp.allclose(mean_bf16, ref, atol=5e-2, rtol=5e-2), "Pallas bf16 result mismatch"

    # TODO(synk): sample()'s in-place torch noise (normal_/clamp) is host-side RNG
    # state, not part of forward(); omitted here.
    print("KERNEL_OK")
</pallas_src>

<mosaic_0001>
module attributes {stable_mosaic.version = 11 : i64} {
  func.func @_apd_kernel(%arg0: i32, %arg1: memref<2x16xf32, #tpu.memory_space<vmem>>, %arg2: memref<280x128xf32, #tpu.memory_space<vmem>>, %arg3: memref<2x8xf32, #tpu.memory_space<vmem>>) attributes {dimension_semantics = [#tpu.dimension_semantics<parallel>], iteration_bounds = array<i64: 1>, scalar_prefetch = 0 : i64, scratch_operands = 0 : i64, tpu.core_type = #tpu.core_type<tc>, window_params = [{transform_indices = @transform_0, window_bounds = array<i64: 2, 16>}, {pipeline_mode = #tpu.pipeline_mode<synchronous>, transform_indices = @transform_1, window_bounds = array<i64: 280, 128>}, {transform_indices = @transform_2, window_bounds = array<i64: 2, 8>}]} {
    %c0 = arith.constant 0 : index
    %c0_0 = arith.constant 0 : index
    %0 = vector.load %arg2[%c0, %c0_0] : memref<280x128xf32, #tpu.memory_space<vmem>>, vector<16x128xf32>
    %c16 = arith.constant 16 : index
    %c0_1 = arith.constant 0 : index
    %1 = vector.load %arg2[%c16, %c0_1] : memref<280x128xf32, #tpu.memory_space<vmem>>, vector<128x128xf32>
    %c144 = arith.constant 144 : index
    %c0_2 = arith.constant 0 : index
    %2 = vector.load %arg2[%c144, %c0_2] : memref<280x128xf32, #tpu.memory_space<vmem>>, vector<128x128xf32>
    %c272 = arith.constant 272 : index
    %c0_3 = arith.constant 0 : index
    %3 = vector.load %arg2[%c272, %c0_3] : memref<280x128xf32, #tpu.memory_space<vmem>>, vector<8x128xf32>
    %4 = vector.extract_strided_slice %3 {offsets = [0, 0], sizes = [1, 128], strides = [1, 1]} : vector<8x128xf32> to vector<1x128xf32>
    %5 = vector.extract_strided_slice %3 {offsets = [1, 0], sizes = [1, 128], strides = [1, 1]} : vector<8x128xf32> to vector<1x128xf32>
    %6 = vector.extract_strided_slice %3 {offsets = [2, 0], sizes = [1, 128], strides = [1, 1]} : vector<8x128xf32> to vector<1x128xf32>
    %c0_4 = arith.constant 0 : index
    %c0_5 = arith.constant 0 : index
    %7 = vector.load %arg1[%c0_4, %c0_5] : memref<2x16xf32, #tpu.memory_space<vmem>>, vector<2x16xf32>
    %cst = arith.constant dense<0.000000e+00> : vector<2x128xf32>
    %8 = tpu.matmul %7, %0, %cst {dimension_numbers = #tpu.dot_dimension_numbers<[1], [0], [0], [1], [0, 0, 1, 1], [], []>} : vector<2x16xf32>, vector<16x128xf32>, vector<2x128xf32> -> vector<2x128xf32>
    %9 = vector.broadcast %4 : vector<1x128xf32> to vector<2x128xf32>
    %10 = arith.addf %8, %9 : vector<2x128xf32>
    %cst_6 = arith.constant 0.000000e+00 : f32
    %11 = vector.broadcast %cst_6 : f32 to vector<2x128xf32>
    %12 = arith.maximumf %10, %11 : vector<2x128xf32>
    %cst_7 = arith.constant dense<0.000000e+00> : vector<2x128xf32>
    %13 = tpu.matmul %12, %1, %cst_7 {dimension_numbers = #tpu.dot_dimension_numbers<[1], [0], [0], [1], [0, 0, 1, 1], [], []>} : vector<2x128xf32>, vector<128x128xf32>, vector<2x128xf32> -> vector<2x128xf32>
    %14 = vector.broadcast %5 : vector<1x128xf32> to vector<2x128xf32>
    %15 = arith.addf %13, %14 : vector<2x128xf32>
    %cst_8 = arith.constant 0.000000e+00 : f32
    %16 = vector.broadcast %cst_8 : f32 to vector<2x128xf32>
    %17 = arith.maximumf %15, %16 : vector<2x128xf32>
    %cst_9 = arith.constant dense<0.000000e+00> : vector<2x128xf32>
    %18 = tpu.matmul %17, %2, %cst_9 {dimension_numbers = #tpu.dot_dimension_numbers<[1], [0], [0], [1], [0, 0, 1, 1], [], []>} : vector<2x128xf32>, vector<128x128xf32>, vector<2x128xf32> -> vector<2x128xf32>
    %19 = vector.broadcast %6 : vector<1x128xf32> to vector<2x128xf32>
    %20 = arith.addf %18, %19 : vector<2x128xf32>
    %21 = vector.extract_strided_slice %20 {offsets = [0, 0], sizes = [2, 8], strides = [1, 1]} : vector<2x128xf32> to vector<2x8xf32>
    %c0_10 = arith.constant 0 : index
    %c0_11 = arith.constant 0 : index
    %22 = vector.load %arg3[%c0_10, %c0_11] : memref<2x8xf32, #tpu.memory_space<vmem>>, vector<2x8xf32>
    tpu.vector_store %arg3[%c0_10, %c0_11], %21 {strides = array<i32>} : memref<2x8xf32, #tpu.memory_space<vmem>>, vector<2x8xf32>,
    return
  }
  func.func @transform_0(%arg0: i32) -> (i32, i32) {
    %c0_i32 = arith.constant 0 : i32
    %c0_i32_0 = arith.constant 0 : i32
    return %arg0, %c0_i32 : i32, i32
  }
  func.func @transform_1(%arg0: i32) -> (i32, i32) {
    %c0_i32 = arith.constant 0 : i32
    %c0_i32_0 = arith.constant 0 : i32
    %c0_i32_1 = arith.constant 0 : i32
    return %c0_i32, %c0_i32_0 : i32, i32
  }
  func.func @transform_2(%arg0: i32) -> (i32, i32) {
    %c0_i32 = arith.constant 0 : i32
    %c0_i32_0 = arith.constant 0 : i32
    return %arg0, %c0_i32 : i32, i32
  }
}

</mosaic_0001>

<bundles_post_ra>
// kernel: tpu_custom_call.1
= control target key start
LH: loop header
LB: loop body
LE: loop exit
PB: predicated region body
PF: predicated region fallthrough
CT: control target
= control target key end

     0   :  { %7 = vsyncpa [#allocation3], 0  ;;  %s280_s0 = inlined_call_operand.hbm [shape: f32[2,16], index: 0, kind: input, shape index: {}]   ;;  %s281_s1 = inlined_call_operand.hbm [shape: f32[280,128], index: 1, kind: input, shape index: {}]   ;;  %s282_s2 = inlined_call_operand.hbm [shape: f32[2,8], index: 2, kind: output, shape index: {}]  }
   0x1   :  { %8 = vsyncpa [#allocation6], 0 }
   0x2   :  { %9 = vsyncpa [#allocation4], 0  ;;  %s15_s11 = sshll.u32 %s280_s0, 4  ;;  %s251_s12 = smov [#allocation2]   ;;  %s16_s11 = int_to_ptr.hbm [resolvable:$true] %s15_s11 }
   0x3   :  { %s17_s13 = sshll.u32 %s251_s12, 4  ;;  %s25_s16 = sshll.u32 %s281_s1, 4  ;;  %s18_s13 = int_to_ptr.vmem [resolvable:$true] %s17_s13  ;;  %s26_s16 = int_to_ptr.hbm [resolvable:$true] %s25_s16 }
   0x4   :  { %20 = dma.hbm_to_vmem [thread:$0]  %s16_s11, 32, %s18_s13, [#allocation3]  }
   0x5   :  { %s252_s17 = smov [#allocation5]   ;;  %s253_s19 = smov 128  }
   0x6   :  { %s27_s18 = sshll.u32 %s252_s17, 4  ;;  %s254_s20 = smov 8   ;;  %s28_s18 = int_to_ptr.vmem [resolvable:$true] %s27_s18 }
   0x7   :  { %33 = dma.hbm_to_vmem [thread:$0]  %s26_s16, 4480, %s28_s18, [#allocation6], %s253_s19, %s253_s19, %s254_s20  }
   0x8   :  { %245 = dma.done.wait [#allocation3], 32  }
   0x9   :  { %246 = vsyncadd [#allocation3], 4294967264 }
   0xa   :  { %247 = dma.done.wait [#allocation6], 4480  }
   0xb   :  { %248 = vsyncadd [#allocation6], 4294962816  ;;  %v43_v0 = vld [vmem:[#allocation5 + $0x8] sm:$0xff]  ;;  %v42_v1 = vld [vmem:[#allocation5] sm:$0xff]  ;;  %vm79_vm0 = vcmask 130048   ;;  %s255_s0 = smov [#allocation7]  }
   0xc   :  { %97 = vmatpush.msra.mxu0 %v43_v0  ;;  %v77_v2 = vld [vmem:[#allocation2] sm:$0x3]  ;;  %v59_v3 = vld [vmem:[#allocation5 + $0x88] sm:$0xff]  ;;  %v58_v4 = vld [vmem:[#allocation5 + $0x80] sm:$0xff]  ;;  %s154_s1 = sshll.u32 %s255_s0, 4  ;;  %s156_s23 = sshll.u32 %s282_s2, 4  ;;  %s155_s1 = int_to_ptr.vmem [resolvable:$true] %s154_s1  ;;  %s157_s23 = int_to_ptr.hbm [resolvable:$true] %s156_s23 }
   0xd   :  { %105 = vmatpush.msra.mxu1 %v59_v3  ;;  %v57_v5 = vld [vmem:[#allocation5 + $0x78] sm:$0xff]  ;;  %v56_v6 = vld [vmem:[#allocation5 + $0x70] sm:$0xff]  ;;  %v55_v7 = vld [vmem:[#allocation5 + $0x68] sm:$0xff]  ;;  %vm147_vm1 = vcmask 58368  }
   0xe   :  { %98 = vmatpush.msra.mxu0 %v42_v1  ;;  %v54_v8 = vld [vmem:[#allocation5 + $0x60] sm:$0xff]  ;;  %v53_v9 = vld [vmem:[#allocation5 + $0x58] sm:$0xff]  ;;  %v52_v10 = vld [vmem:[#allocation5 + $0x50] sm:$0xff] }
   0xf   :  { %167 = vmatmul.msk.f32.vlgmr.msra.gmra.mxu0 %vm79_vm0, %v77_v2  ;;  %106 = vmatpush.msra.mxu1 %v58_v4  ;;  %v51_v11 = vld [vmem:[#allocation5 + $0x48] sm:$0xff]  ;;  %v50_v12 = vld [vmem:[#allocation5 + $0x40] sm:$0xff]  ;;  %v49_v13 = vld [vmem:[#allocation5 + $0x38] sm:$0xff] }
  0x10   :  { %v48_v14 = vld [vmem:[#allocation5 + $0x30] sm:$0xff]  ;;  %v47_v15 = vld [vmem:[#allocation5 + $0x28] sm:$0xff]  ;;  %v46_v16 = vld [vmem:[#allocation5 + $0x20] sm:$0xff] }
  0x11   :  { %107 = vmatpush.msra.mxu1 %v57_v5  ;;  %v45_v17 = vld [vmem:[#allocation5 + $0x18] sm:$0xff]  ;;  %v44_v18 = vld [vmem:[#allocation5 + $0x10] sm:$0xff]  ;;  %v75_v19 = vld [vmem:[#allocation5 + $0x108] sm:$0xff] }
  0x12   :  { %v74_v20 = vld [vmem:[#allocation5 + $0x100] sm:$0xff]  ;;  %127 = vmatpush.msra.mxu2 %v75_v19  ;;  %v73_v21 = vld [vmem:[#allocation5 + $0xf8] sm:$0xff]  ;;  %v72_v22 = vld [vmem:[#allocation5 + $0xf0] sm:$0xff] }
  0x13   :  { %108 = vmatpush.msra.mxu1 %v56_v6  ;;  %v71_v23 = vld [vmem:[#allocation5 + $0xe8] sm:$0xff]  ;;  %v70_v24 = vld [vmem:[#allocation5 + $0xe0] sm:$0xff]  ;;  %v69_v25 = vld [vmem:[#allocation5 + $0xd8] sm:$0xff] }
  0x14   :  { %128 = vmatpush.msra.mxu2 %v74_v20  ;;  %v68_v26 = vld [vmem:[#allocation5 + $0xd0] sm:$0xff]  ;;  %v67_v27 = vld [vmem:[#allocation5 + $0xc8] sm:$0xff]  ;;  %v66_v28 = vld [vmem:[#allocation5 + $0xc0] sm:$0xff] }
  0x15   :  { %109 = vmatpush.msra.mxu1 %v55_v7  ;;  %v65_v29 = vld [vmem:[#allocation5 + $0xb8] sm:$0xff]  ;;  %v64_v30 = vld [vmem:[#allocation5 + $0xb0] sm:$0xff]  ;;  %v63_v32 = vld [vmem:[#allocation5 + $0xa8] sm:$0xff] }
  0x16   :  { %129 = vmatpush.msra.mxu2 %v73_v21  ;;  %v76_v31 = vld [vmem:[#allocation5 + $0x110] sm:$0xff]  ;;  %v62_v37 = vld [vmem:[#allocation5 + $0xa0] sm:$0xff]  ;;  %v61_v38 = vld [vmem:[#allocation5 + $0x98] sm:$0xff] }
  0x17   :  { %110 = vmatpush.msra.mxu1 %v54_v8  ;;  %v78_v33 = vperm.slane %v76_v31, 0  ;;  %v60_v39 = vld [vmem:[#allocation5 + $0x90] sm:$0xff]  ;;  %v104_v40 = vperm.slane %v76_v31, 1  ;;  %v126_v44 = vperm.slane %v76_v31, 2 }
  0x18   :  { %130 = vmatpush.msra.mxu2 %v72_v22 }
  0x19   :  { %111 = vmatpush.msra.mxu1 %v53_v9 }
  0x1a   :  { %131 = vmatpush.msra.mxu2 %v71_v23 }
  0x1b   :  { %112 = vmatpush.msra.mxu1 %v52_v10 }
  0x1c   :  { %132 = vmatpush.msra.mxu2 %v70_v24 }
  0x1d   :  { %113 = vmatpush.msra.mxu1 %v51_v11 }
  0x1e   :  { %133 = vmatpush.msra.mxu2 %v69_v25 }
  0x1f   :  { %114 = vmatpush.msra.mxu1 %v50_v12 }
  0x20   :  { %134 = vmatpush.msra.mxu2 %v68_v26 }
  0x21   :  { %115 = vmatpush.msra.mxu1 %v49_v13 }
  0x22   :  { %135 = vmatpush.msra.mxu2 %v67_v27 }
  0x23   :  { %116 = vmatpush.msra.mxu1 %v48_v14 }
  0x24   :  { %136 = vmatpush.msra.mxu2 %v66_v28 }
  0x25   :  { %117 = vmatpush.msra.mxu1 %v47_v15 }
  0x26   :  { %137 = vmatpush.msra.mxu2 %v65_v29 }
  0x27   :  { %118 = vmatpush.msra.mxu1 %v46_v16 }
  0x28   :  { %138 = vmatpush.msra.mxu2 %v64_v30 }
  0x29   :  { %119 = vmatpush.msra.mxu1 %v45_v17 }
  0x2a   :  { %139 = vmatpush.msra.mxu2 %v63_v32 }
  0x2b   :  { %120 = vmatpush.msra.mxu1 %v44_v18 }
  0x2c   :  { %140 = vmatpush.msra.mxu2 %v62_v37 }
  0x2e   :  { %141 = vmatpush.msra.mxu2 %v61_v38 }
  0x30   :  { %142 = vmatpush.msra.mxu2 %v60_v39 }
  0x8c   :  { %v100_v34 = vpop.f32.mrf.mxu0 }
  0x8d   :  { %v101_v35 = vadd.f32 %v100_v34, %v78_v33 }
  0x8f   :  { %v103_v36 = vmax.f32 %v101_v35, 0.0 }
  0x91   :  { %121 = vmatmul.f32.vlgmr.msra.gmra.mxu1 %v103_v36 }
 0x10e   :  { %v122_v41 = vpop.f32.mrf.mxu1 }
 0x10f   :  { %v123_v42 = vadd.f32 %v122_v41, %v104_v40 }
 0x111   :  { %v125_v43 = vmax.f32 %v123_v42, 0.0 }
 0x113   :  { %143 = vmatmul.f32.vlgmr.msra.gmra.mxu2 %v125_v43 }
 0x196   :  { %v144_v45 = vpop.f32.mrf.mxu2 }
 0x197   :  { %v145_v46 = vadd.f32 %v144_v45, %v126_v44 }
 0x199   :  { %148 = vst.msk [vmem:[#allocation7] sm:$0x3] %vm147_vm1, %v145_v46 }
 0x19a   :  { %159 = dma.vmem_to_hbm [thread:$0]  %s155_s1, 32, %s157_s23, [#allocation4]  }
 0x19b   :  { %249 = dma.done.wait [#allocation4], 32  }
 0x19c   :  { %250 = vsyncadd [#allocation4], 4294967264 }
 0x19d   :  { %164 = vsyncpa [#allocation3], 1 }
 0x19e   :  { %165 = vsyncpa [#allocation6], 1 }
 0x19f   :  { %166 = vsyncpa [#allocation4], 1 }

</bundles_post_ra>
